<compile_context>
chip_gen: v7x
topology: tpu7x:2x2x1
jax: 0.10.0
libtpu: 0.0.40
codegen_flags: <defaults>
</compile_context>

<pallas_src>
import math

import jax
import jax.numpy as jnp
from jax.experimental import pallas as pl
from jax.experimental.pallas import tpu as pltpu

N_OUT_PAD = 128  # lane-dense padded output width


# ----------------------------- Pallas kernel --------------------------------
def critic_mlp_kernel(s_ref, a_ref, w1s_ref, w1a_ref, b1_ref,
                      w2_ref, b2_ref, w3_ref, b3_ref, o_ref):
    # MXU inputs in bf16, f32 accumulation, f32 epilogue (bias + ReLU).
    s = s_ref[...].astype(jnp.bfloat16)
    a = a_ref[...].astype(jnp.bfloat16)
    h1 = jnp.dot(s, w1s_ref[...], preferred_element_type=jnp.float32)
    h1 = h1 + jnp.dot(a, w1a_ref[...], preferred_element_type=jnp.float32)
    h1 = jnp.maximum(h1 + b1_ref[...], 0.0)                    # ReLU (f32)
    h2 = jnp.dot(h1.astype(jnp.bfloat16), w2_ref[...],
                 preferred_element_type=jnp.float32)
    h2 = jnp.maximum(h2 + b2_ref[...], 0.0)                    # ReLU (f32)
    q = jnp.dot(h2.astype(jnp.bfloat16), w3_ref[...],
                preferred_element_type=jnp.float32)
    o_ref[...] = (q + b3_ref[...]).astype(o_ref.dtype)


def _round_up(x, m):
    return (x + m - 1) // m * m


def critic_forward(state, action, packed_params, *, n_output, tb=256):
    """Pallas forward pass of CriticNetwork. Returns squeezed Q values."""
    w1s, w1a, b1, w2, b2, w3p, b3p = packed_params
    state = state.astype(jnp.float32)    # torch .float()
    action = action.astype(jnp.float32)

    B, sd = state.shape
    ad = action.shape[1]
    n_in = sd + ad

    # Batch tiling: small batches become a single (8-aligned) tile; large
    # batches are tiled TB rows per grid step (double-buffered, VMEM-bounded).
    b8 = _round_up(B, 8)
    TB = min(tb, b8)
    B_pad = _round_up(B, TB)
    if B_pad != B:
        state = jnp.pad(state, ((0, B_pad - B), (0, 0)))
        action = jnp.pad(action, ((0, B_pad - B), (0, 0)))
    nb = B_pad // TB

    flops = 2 * B_pad * (n_in * 512 + 512 * 256 + 256 * N_OUT_PAD)
    bytes_accessed = int(
        state.size * 4 + action.size * 4 + B_pad * N_OUT_PAD * 4
        + sum(int(w.size) * w.dtype.itemsize
              for w in (w1s, w1a, b1, w2, b2, w3p, b3p)))

    const = lambda shape: pl.BlockSpec(shape, lambda i: (0, 0))

    q_pad = pl.pallas_call(
        critic_mlp_kernel,
        out_shape=jax.ShapeDtypeStruct((B_pad, N_OUT_PAD), jnp.float32),
        grid=(nb,),
        in_specs=[
            pl.BlockSpec((TB, sd), lambda i: (i, 0)),   # state tile
            pl.BlockSpec((TB, ad), lambda i: (i, 0)),   # action tile
            const(w1s.shape), const(w1a.shape), const(b1.shape),
            const(w2.shape), const(b2.shape),
            const(w3p.shape), const(b3p.shape),
        ],
        out_specs=pl.BlockSpec((TB, N_OUT_PAD), lambda i: (i, 0)),
        compiler_params=pltpu.CompilerParams(
            dimension_semantics=("parallel",)),
        cost_estimate=pl.CostEstimate(
            flops=flops, transcendentals=0, bytes_accessed=bytes_accessed),
    )(state, action, w1s, w1a, b1, w2, b2, w3p, b3p)

    q = q_pad[:B, :n_output]
    return jnp.squeeze(q)               # torch.squeeze(q)


# ------------------------- deterministic param init -------------------------
def xavier_uniform(key, fan_in, fan_out, gain):
    bound = gain * math.sqrt(6.0 / (fan_in + fan_out))
    # stored as (in, out); same distribution as torch's (out, in) transposed
    return jax.random.uniform(key, (fan_in, fan_out), jnp.float32,
                              minval=-bound, maxval=bound)


def linear_bias(key, fan_in, fan_out):
    # PyTorch nn.Linear default bias init: U(-1/sqrt(fan_in), 1/sqrt(fan_in))
    bound = 1.0 / math.sqrt(fan_in)
    return jax.random.uniform(key, (1, fan_out), jnp.float32,
                              minval=-bound, maxval=bound)


def init_params(key, n_input, n_output):
    ks = jax.random.split(key, 6)
    gain_relu = math.sqrt(2.0)   # nn.init.calculate_gain('relu')
    gain_lin = 1.0               # nn.init.calculate_gain('linear')
    w1 = xavier_uniform(ks[0], n_input, 512, gain_relu)
    b1 = linear_bias(ks[1], n_input, 512)
    w2 = xavier_uniform(ks[2], 512, 256, gain_relu)
    b2 = linear_bias(ks[3], 512, 256)
    w3 = xavier_uniform(ks[4], 256, n_output, gain_lin)
    b3 = linear_bias(ks[5], 256, n_output)
    return (w1, b1, w2, b2, w3, b3)


def pack_params(params, state_dim):
    """Split w1 (no concat needed), cast weights to bf16, lane-pad layer 3."""
    w1, b1, w2, b2, w3, b3 = params
    n_out = w3.shape[1]
    w1s = w1[:state_dim].astype(jnp.bfloat16)
    w1a = w1[state_dim:].astype(jnp.bfloat16)
    w3p = jnp.zeros((w3.shape[0], N_OUT_PAD), jnp.bfloat16)
    w3p = w3p.at[:, :n_out].set(w3.astype(jnp.bfloat16))
    b3p = jnp.zeros((1, N_OUT_PAD), jnp.float32).at[:, :n_out].set(b3)
    return (w1s, w1a, b1, w2.astype(jnp.bfloat16), b2, w3p, b3p)


# ---------------------------------- main -------------------------------------
if __name__ == "__main__":
    # Small shapes: state_dim=12, action_dim=4 -> n_input = 16, n_output = 1.
    B, state_dim, action_dim, n_output = 8, 12, 4, 1
    n_input = state_dim + action_dim

    key = jax.random.PRNGKey(0)
    k_state, k_action, k_params = jax.random.split(key, 3)

    state = jax.random.normal(k_state, (B, state_dim), jnp.float32)
    action = jax.random.normal(k_action, (B, action_dim), jnp.float32)
    params = init_params(k_params, n_input, n_output)
    packed = pack_params(params, state_dim)

    q = critic_forward(state, action, packed, n_output=n_output)
    q = jax.block_until_ready(q)
    assert q.shape == (B,), q.shape

    # Reference 1: same bf16-input / f32-accumulate math as the kernel.
    w1s, w1a, b1, w2b, b2, w3p, b3p = packed
    sb = state.astype(jnp.bfloat16)
    ab = action.astype(jnp.bfloat16)
    h1 = jnp.maximum(
        jnp.dot(sb, w1s, preferred_element_type=jnp.float32)
        + jnp.dot(ab, w1a, preferred_element_type=jnp.float32) + b1, 0.0)
    h2 = jnp.maximum(
        jnp.dot(h1.astype(jnp.bfloat16), w2b,
                preferred_element_type=jnp.float32) + b2, 0.0)
    q_bf = jnp.squeeze(
        (jnp.dot(h2.astype(jnp.bfloat16), w3p,
                 preferred_element_type=jnp.float32) + b3p)[:, :n_output])
    assert jnp.allclose(q, q_bf, atol=1e-2, rtol=1e-2), (q, q_bf)

    # Reference 2: original full-f32 module semantics (loose tol for bf16 MXU).
    w1, b1f, w2f, b2f, w3f, b3f = params
    x = jnp.concatenate([state, action], axis=1)
    h1f = jnp.maximum(x @ w1 + b1f, 0.0)
    h2f = jnp.maximum(h1f @ w2f + b2f, 0.0)
    q_f32 = jnp.squeeze(h2f @ w3f + b3f)
    assert jnp.allclose(q, q_f32, atol=1e-1, rtol=1e-1), (q, q_f32)

    print("KERNEL_OK")
</pallas_src>

<mosaic_0001>
module attributes {stable_mosaic.version = 11 : i64} {
  func.func @critic_mlp_kernel(%arg0: i32, %arg1: memref<8x12xf32, #tpu.memory_space<vmem>>, %arg2: memref<8x4xf32, #tpu.memory_space<vmem>>, %arg3: memref<12x512xbf16, #tpu.memory_space<vmem>>, %arg4: memref<4x512xbf16, #tpu.memory_space<vmem>>, %arg5: memref<1x512xf32, #tpu.memory_space<vmem>>, %arg6: memref<512x256xbf16, #tpu.memory_space<vmem>>, %arg7: memref<1x256xf32, #tpu.memory_space<vmem>>, %arg8: memref<256x128xbf16, #tpu.memory_space<vmem>>, %arg9: memref<1x128xf32, #tpu.memory_space<vmem>>, %arg10: memref<8x128xf32, #tpu.memory_space<vmem>>) attributes {dimension_semantics = [#tpu.dimension_semantics<parallel>], iteration_bounds = array<i64: 1>, scalar_prefetch = 0 : i64, scratch_operands = 0 : i64, tpu.core_type = #tpu.core_type<tc>, window_params = [{transform_indices = @transform_0, window_bounds = array<i64: 8, 12>}, {transform_indices = @transform_1, window_bounds = array<i64: 8, 4>}, {pipeline_mode = #tpu.pipeline_mode<synchronous>, transform_indices = @transform_2, window_bounds = array<i64: 12, 512>}, {pipeline_mode = #tpu.pipeline_mode<synchronous>, transform_indices = @transform_3, window_bounds = array<i64: 4, 512>}, {pipeline_mode = #tpu.pipeline_mode<synchronous>, transform_indices = @transform_4, window_bounds = array<i64: 1, 512>}, {pipeline_mode = #tpu.pipeline_mode<synchronous>, transform_indices = @transform_5, window_bounds = array<i64: 512, 256>}, {pipeline_mode = #tpu.pipeline_mode<synchronous>, transform_indices = @transform_6, window_bounds = array<i64: 1, 256>}, {pipeline_mode = #tpu.pipeline_mode<synchronous>, transform_indices = @transform_7, window_bounds = array<i64: 256, 128>}, {pipeline_mode = #tpu.pipeline_mode<synchronous>, transform_indices = @transform_8, window_bounds = array<i64: 1, 128>}, {transform_indices = @transform_9, window_bounds = array<i64: 8, 128>}]} {
    %c0 = arith.constant 0 : index
    %c0_0 = arith.constant 0 : index
    %0 = vector.load %arg1[%c0, %c0_0] : memref<8x12xf32, #tpu.memory_space<vmem>>, vector<8x12xf32>
    %1 = arith.truncf %0 : vector<8x12xf32> to vector<8x12xbf16>
    %c0_1 = arith.constant 0 : index
    %c0_2 = arith.constant 0 : index
    %2 = vector.load %arg2[%c0_1, %c0_2] : memref<8x4xf32, #tpu.memory_space<vmem>>, vector<8x4xf32>
    %3 = arith.truncf %2 : vector<8x4xf32> to vector<8x4xbf16>
    %c0_3 = arith.constant 0 : index
    %c0_4 = arith.constant 0 : index
    %4 = vector.load %arg3[%c0_3, %c0_4] : memref<12x512xbf16, #tpu.memory_space<vmem>>, vector<12x512xbf16>
    %cst = arith.constant dense<0.000000e+00> : vector<8x512xf32>
    %5 = tpu.matmul %1, %4, %cst {dimension_numbers = #tpu.dot_dimension_numbers<[1], [0], [0], [1], [0, 0, 1, 1], [], []>} : vector<8x12xbf16>, vector<12x512xbf16>, vector<8x512xf32> -> vector<8x512xf32>
    %c0_5 = arith.constant 0 : index
    %c0_6 = arith.constant 0 : index
    %6 = vector.load %arg4[%c0_5, %c0_6] : memref<4x512xbf16, #tpu.memory_space<vmem>>, vector<4x512xbf16>
    %cst_7 = arith.constant dense<0.000000e+00> : vector<8x512xf32>
    %7 = tpu.matmul %3, %6, %cst_7 {dimension_numbers = #tpu.dot_dimension_numbers<[1], [0], [0], [1], [0, 0, 1, 1], [], []>} : vector<8x4xbf16>, vector<4x512xbf16>, vector<8x512xf32> -> vector<8x512xf32>
    %8 = arith.addf %5, %7 : vector<8x512xf32>
    %c0_8 = arith.constant 0 : index
    %c0_9 = arith.constant 0 : index
    %9 = vector.load %arg5[%c0_8, %c0_9] : memref<1x512xf32, #tpu.memory_space<vmem>>, vector<1x512xf32>
    %10 = vector.broadcast %9 : vector<1x512xf32> to vector<8x512xf32>
    %11 = arith.addf %8, %10 : vector<8x512xf32>
    %cst_10 = arith.constant 0.000000e+00 : f32
    %12 = vector.broadcast %cst_10 : f32 to vector<8x512xf32>
    %13 = arith.maximumf %11, %12 : vector<8x512xf32>
    %14 = arith.truncf %13 : vector<8x512xf32> to vector<8x512xbf16>
    %c0_11 = arith.constant 0 : index
    %c0_12 = arith.constant 0 : index
    %15 = vector.load %arg6[%c0_11, %c0_12] : memref<512x256xbf16, #tpu.memory_space<vmem>>, vector<512x256xbf16>
    %cst_13 = arith.constant dense<0.000000e+00> : vector<8x256xf32>
    %16 = tpu.matmul %14, %15, %cst_13 {dimension_numbers = #tpu.dot_dimension_numbers<[1], [0], [0], [1], [0, 0, 1, 1], [], []>} : vector<8x512xbf16>, vector<512x256xbf16>, vector<8x256xf32> -> vector<8x256xf32>
    %c0_14 = arith.constant 0 : index
    %c0_15 = arith.constant 0 : index
    %17 = vector.load %arg7[%c0_14, %c0_15] : memref<1x256xf32, #tpu.memory_space<vmem>>, vector<1x256xf32>
    %18 = vector.broadcast %17 : vector<1x256xf32> to vector<8x256xf32>
    %19 = arith.addf %16, %18 : vector<8x256xf32>
    %cst_16 = arith.constant 0.000000e+00 : f32
    %20 = vector.broadcast %cst_16 : f32 to vector<8x256xf32>
    %21 = arith.maximumf %19, %20 : vector<8x256xf32>
    %22 = arith.truncf %21 : vector<8x256xf32> to vector<8x256xbf16>
    %c0_17 = arith.constant 0 : index
    %c0_18 = arith.constant 0 : index
    %23 = vector.load %arg8[%c0_17, %c0_18] : memref<256x128xbf16, #tpu.memory_space<vmem>>, vector<256x128xbf16>
    %cst_19 = arith.constant dense<0.000000e+00> : vector<8x128xf32>
    %24 = tpu.matmul %22, %23, %cst_19 {dimension_numbers = #tpu.dot_dimension_numbers<[1], [0], [0], [1], [0, 0, 1, 1], [], []>} : vector<8x256xbf16>, vector<256x128xbf16>, vector<8x128xf32> -> vector<8x128xf32>
    %c0_20 = arith.constant 0 : index
    %c0_21 = arith.constant 0 : index
    %25 = vector.load %arg9[%c0_20, %c0_21] : memref<1x128xf32, #tpu.memory_space<vmem>>, vector<1x128xf32>
    %26 = vector.broadcast %25 : vector<1x128xf32> to vector<8x128xf32>
    %27 = arith.addf %24, %26 : vector<8x128xf32>
    %c0_22 = arith.constant 0 : index
    %c0_23 = arith.constant 0 : index
    %28 = vector.load %arg10[%c0_22, %c0_23] : memref<8x128xf32, #tpu.memory_space<vmem>>, vector<8x128xf32>
    tpu.vector_store %arg10[%c0_22, %c0_23], %27 {strides = array<i32>} : memref<8x128xf32, #tpu.memory_space<vmem>>, vector<8x128xf32>,
    return
  }
  func.func @transform_0(%arg0: i32) -> (i32, i32) {
    %c0_i32 = arith.constant 0 : i32
    %c0_i32_0 = arith.constant 0 : i32
    return %arg0, %c0_i32 : i32, i32
  }
  func.func @transform_1(%arg0: i32) -> (i32, i32) {
    %c0_i32 = arith.constant 0 : i32
    %c0_i32_0 = arith.constant 0 : i32
    return %arg0, %c0_i32 : i32, i32
  }
  func.func @transform_2(%arg0: i32) -> (i32, i32) {
    %c0_i32 = arith.constant 0 : i32
    %c0_i32_0 = arith.constant 0 : i32
    %c0_i32_1 = arith.constant 0 : i32
    return %c0_i32, %c0_i32_0 : i32, i32
  }
  func.func @transform_3(%arg0: i32) -> (i32, i32) {
    %c0_i32 = arith.constant 0 : i32
    %c0_i32_0 = arith.constant 0 : i32
    %c0_i32_1 = arith.constant 0 : i32
    return %c0_i32, %c0_i32_0 : i32, i32
  }
  func.func @transform_4(%arg0: i32) -> (i32, i32) {
    %c0_i32 = arith.constant 0 : i32
    %c0_i32_0 = arith.constant 0 : i32
    %c0_i32_1 = arith.constant 0 : i32
    return %c0_i32, %c0_i32_0 : i32, i32
  }
  func.func @transform_5(%arg0: i32) -> (i32, i32) {
    %c0_i32 = arith.constant 0 : i32
    %c0_i32_0 = arith.constant 0 : i32
    %c0_i32_1 = arith.constant 0 : i32
    return %c0_i32, %c0_i32_0 : i32, i32
  }
  func.func @transform_6(%arg0: i32) -> (i32, i32) {
    %c0_i32 = arith.constant 0 : i32
    %c0_i32_0 = arith.constant 0 : i32
    %c0_i32_1 = arith.constant 0 : i32
    return %c0_i32, %c0_i32_0 : i32, i32
  }
  func.func @transform_7(%arg0: i32) -> (i32, i32) {
    %c0_i32 = arith.constant 0 : i32
    %c0_i32_0 = arith.constant 0 : i32
    %c0_i32_1 = arith.constant 0 : i32
    return %c0_i32, %c0_i32_0 : i32, i32
  }
  func.func @transform_8(%arg0: i32) -> (i32, i32) {
    %c0_i32 = arith.constant 0 : i32
    %c0_i32_0 = arith.constant 0 : i32
    %c0_i32_1 = arith.constant 0 : i32
    return %c0_i32, %c0_i32_0 : i32, i32
  }
  func.func @transform_9(%arg0: i32) -> (i32, i32) {
    %c0_i32 = arith.constant 0 : i32
    %c0_i32_0 = arith.constant 0 : i32
    return %arg0, %c0_i32 : i32, i32
  }
}

</mosaic_0001>

<bundles_post_ra>
// kernel: tpu_custom_call.1
= control target key start
LH: loop header
LB: loop body
LE: loop exit
PB: predicated region body
PF: predicated region fallthrough
CT: control target
= control target key end

     0   :  { %14 = vsyncpa [#allocation3], 0  ;;  %s1527_s0 = inlined_call_operand.vmem [shape: f32[8,12], index: 0, kind: input, shape index: {}]   ;;  %s1528_s1 = inlined_call_operand.vmem [shape: f32[8,4], index: 1, kind: input, shape index: {}]   ;;  %s1529_s2 = inlined_call_operand.hbm [shape: bf16[12,512], index: 2, kind: input, shape index: {}]   ;;  %s1530_s3 = inlined_call_operand.vmem [shape: bf16[4,512], index: 3, kind: input, shape index: {}]   ;;  %s1531_s4 = inlined_call_operand.vmem [shape: f32[1,512], index: 4, kind: input, shape index: {}]   ;;  %s1532_s5 = inlined_call_operand.hbm [shape: bf16[512,256], index: 5, kind: input, shape index: {}]   ;;  %s1533_s6 = inlined_call_operand.vmem [shape: f32[1,256], index: 6, kind: input, shape index: {}]   ;;  %s1534_s7 = inlined_call_operand.hbm [shape: bf16[256,128], index: 7, kind: input, shape index: {}]   ;;  %s1535_s8 = inlined_call_operand.vmem [shape: f32[1,128], index: 8, kind: input, shape index: {}]   ;;  %s1536_s9 = inlined_call_operand.hbm [shape: f32[8,128], index: 9, kind: output, shape index: {}]  }
   0x1   :  { %15 = vsyncpa [#allocation6], 0 }
   0x2   :  { %16 = vsyncpa [#allocation4], 0  ;;  %s1368_s30 = smov [#allocation5]   ;;  %s1274_s13 = scalar_lea.hbm %s1532_s5, 8192 }
   0x3   :  { %s42_s10 = sshll.u32 %s1368_s30, 4  ;;  %p1275_p0 = scmp.ne.s32.totalorder %s1532_s5, %s1274_s13  ;;  %s43_s10 = int_to_ptr.vmem [resolvable:$true] %s42_s10 }
   0x4   :  { %p1278_p1 = scmp.lt.u32.totalorder %s1274_s13, %s1532_s5 }
   0x6   :  { %p1280_p2 = pnand %p1278_p1, %p1275_p0 }
   0x8   :  { %1283 = shalt.err (!%p1280_p2)
}
   0x9   :  { %s1284_s18 = scalar_lea.vmem %s43_s10, 8192  ;;  %p1289_p4 = scmp.lt.s32.totalorder %s43_s10, %s43_s10 }
   0xa   :  { %p1285_p3 = scmp.ne.s32.totalorder %s43_s10, %s1284_s18  ;;  %p1290_p5 = scmp.lt.s32.totalorder %s1284_s18, %s1284_s18 }
   0xc   :  { %p1291_p6 = por %p1290_p5, %p1289_p4 }
   0xe   :  { %p1292_p7 = pnand %p1291_p6, %p1285_p3 }
  0x10   :  { %1295 = shalt.err (!%p1292_p7)
}
  0x11   :  { %s1369_s19 = smov 128   ;;  %s1370_s20 = smov 8  }
  0x12   :  { %48 = dma.hbm_to_vmem [thread:$0]  %s1532_s5, 8192, %s43_s10, [#allocation6], %s1369_s19, %s1369_s19, %s1370_s20  }
  0x13   :  { %s1371_s23 = smov [#allocation2]   ;;  %s1296_s27 = scalar_lea.hbm %s1529_s2, 512 }
  0x14   :  { %s26_s24 = sshll.u32 %s1371_s23, 4  ;;  %p1297_p8 = scmp.ne.s32.totalorder %s1529_s2, %s1296_s27  ;;  %s27_s24 = int_to_ptr.vmem [resolvable:$true] %s26_s24 }
  0x15   :  { %p1300_p9 = scmp.lt.u32.totalorder %s1296_s27, %s1529_s2 }
  0x17   :  { %p1302_p10 = pnand %p1300_p9, %p1297_p8 }
  0x19   :  { %1305 = shalt.err (!%p1302_p10)
}
  0x1a   :  { %s1306_s12 = scalar_lea.vmem %s27_s24, 512  ;;  %p1311_p12 = scmp.lt.s32.totalorder %s27_s24, %s27_s24 }
  0x1b   :  { %p1307_p11 = scmp.ne.s32.totalorder %s27_s24, %s1306_s12  ;;  %p1312_p13 = scmp.lt.s32.totalorder %s1306_s12, %s1306_s12 }
  0x1d   :  { %p1313_p0 = por %p1312_p13, %p1311_p12 }
  0x1f   :  { %p1314_p1 = pnand %p1313_p0, %p1307_p11 }
  0x21   :  { %1317 = shalt.err (!%p1314_p1)
}
  0x22   :  { %s1372_s5 = smov 256   ;;  %s1373_s10 = smov 16  }
  0x23   :  { %32 = dma.hbm_to_vmem [thread:$0]  %s1529_s2, 512, %s27_s24, [#allocation3], %s1372_s5, %s1372_s5, %s1373_s10  }
  0x24   :  { %s1374_s15 = smov [#allocation7]   ;;  %s1318_s19 = scalar_lea.hbm %s1534_s7, 2048 }
  0x25   :  { %s56_s16 = sshll.u32 %s1374_s15, 4  ;;  %p1319_p2 = scmp.ne.s32.totalorder %s1534_s7, %s1318_s19  ;;  %s57_s16 = int_to_ptr.vmem [resolvable:$true] %s56_s16 }
  0x26   :  { %p1322_p3 = scmp.lt.u32.totalorder %s1318_s19, %s1534_s7 }
  0x28   :  { %p1324_p4 = pnand %p1322_p3, %p1319_p2 }
  0x2a   :  { %1327 = shalt.err (!%p1324_p4)
}
  0x2b   :  { %s1328_s25 = scalar_lea.vmem %s57_s16, 2048  ;;  %p1333_p6 = scmp.lt.s32.totalorder %s57_s16, %s57_s16 }
  0x2c   :  { %p1329_p5 = scmp.ne.s32.totalorder %s57_s16, %s1328_s25  ;;  %p1334_p7 = scmp.lt.s32.totalorder %s1328_s25, %s1328_s25 }
  0x2e   :  { %p1335_p8 = por %p1334_p7, %p1333_p6 }
  0x30   :  { %p1336_p9 = pnand %p1335_p8, %p1329_p5 }
  0x32   :  { %1339 = shalt.err (!%p1336_p9)
}
  0x33   :  { %s1375_s2 = smov 64   ;;  %s1376_s24 = smov 4  }
  0x34   :  { %62 = dma.hbm_to_vmem [thread:$0]  %s1534_s7, 2048, %s57_s16, [#allocation6], %s1375_s2, %s1375_s2, %s1376_s24  }
  0x35   :  { %1362 = dma.done.wait [#allocation3], 512  }
  0x36   :  { %1363 = vsyncadd [#allocation3], 4294966784 }
  0x37   :  { %1364 = dma.done.wait [#allocation6], 10240  }
  0x38   :  { %1365 = vsyncadd [#allocation6], 4294957056  ;;  %v89_v0 = vlaneseq  ;;  %v1377_v1 = vmov 1983009808   ;;  %v1378_v3 = vmov 0   ;;  %v83_v7 = vld [vmem:[%s1530_s3] sm:$0xff] }
  0x39   :  { %v87_v2 = vunpack.c.l.s4 %v1377_v1  ;;  %151 = vmatprep.mubr.bf16.mxu0 %v1378_v3  ;;  %vm106_vm0 = vcmask 1041408   ;;  %v85_v8 = vcombine.high %v83_v7, %v83_v7  ;;  %v77_v10 = vld [vmem:[%s1528_s1] sm:$0xff]  ;;  %vm102_vm1 = vcmask 31744   ;;  %v1165_v19 = vld [vmem:[#allocation5 + $0x14] ss:$8 sps:$4 sm:$0xff]   ;;  %s1379_s10 = smov [#allocation8]  }
  0x3a   :  { %v1467_v4 = vshrl.u32 %v89_v0, 7  ;;  %v1162_v14 = vld [vmem:[#allocation5 + $0x4] ss:$8 sps:$4 sm:$0xff]   ;;  %v78_v15 = vpack.c.bf16 %v77_v10, %v77_v10  ;;  %v1164_v17 = vld [vmem:[#allocation5] ss:$8 sps:$4 sm:$0xff]   ;;  %vm221_vm2 = vcmask 1045504  }
  0x3b   :  { %v88_v5 = vunpack.c.0.s8 %v87_v2  ;;  %v1156_v18 = vld [vmem:[#allocation2 + $0x4] ss:$16 sps:$4 sm:$0x3f]   ;;  %746 = vmatprep.subr.bf16.mxu1 %v1162_v14  ;;  %v1167_v21 = vld [vmem:[#allocation5 + $0x10] ss:$8 sps:$4 sm:$0xff]   ;;  %vm217_vm3 = vcmask 97280  }
  0x3c   :  { %747 = vmatpush1.bf16.msra.mxu1 %v1164_v17  ;;  %v1168_v22 = vld [vmem:[#allocation5 + $0x24] ss:$8 sps:$4 sm:$0xff]   ;;  %v1158_v23 = vld [vmem:[#allocation2] ss:$16 sps:$4 sm:$0x3f]   ;;  %s1014_s13 = sshll.u32 %s1379_s10, 4  ;;  %s1015_s13 = int_to_ptr.vmem [resolvable:$true] %s1014_s13 }
  0x3d   :  { %v91_v6 = vsub.s32 %v88_v5, %v1467_v4  ;;  %748 = vmatprep.subr.bf16.mxu1 %v1165_v19  ;;  %v1173_v24 = vld [vmem:[#allocation5 + $0x20] ss:$8 sps:$4 sm:$0xff]   ;;  %v1174_v25 = vld [vmem:[#allocation5 + $0x34] ss:$8 sps:$4 sm:$0xff]   ;;  %v223_v27 = vsel %vm221_vm2, %v1158_v23, 0  ;;  %s1340_s14 = scalar_lea.vmem %s1015_s13, 128  ;;  %p1345_p11 = scmp.lt.s32.totalorder %s1015_s13, %s1015_s13 }
  0x3e   :  { %v1159_v26 = vld [vmem:[#allocation2 + $0xc] ss:$16 sps:$4 sm:$0x3f]   ;;  %v1179_v28 = vld [vmem:[#allocation5 + $0x30] ss:$8 sps:$4 sm:$0xff]   ;;  %v75_v30 = vld [vmem:[%s1527_s0] sm:$0xff]  ;;  %p1341_p10 = scmp.ne.s32.totalorder %s1015_s13, %s1340_s14  ;;  %p1346_p12 = scmp.lt.s32.totalorder %s1340_s14, %s1340_s14 }
  0x3f   :  { %v92_v9 = vrot.slane %v83_v7, %v91_v6  ;;  %v99_v11 = vrot.slane %v85_v8, %v91_v6  ;;  %v1180_v29 = vld [vmem:[#allocation5 + $0x44] ss:$8 sps:$4 sm:$0xff]   ;;  %v1161_v31 = vld [vmem:[#allocation2 + $0x8] ss:$16 sps:$4 sm:$0x3f]   ;;  %v76_v34 = vpack.c.bf16 %v75_v30, %v75_v30 }
  0x40   :  { %749 = vmatpush1.bf16.msra.mxu1 %v1167_v21  ;;  %v1185_v32 = vld [vmem:[#allocation5 + $0x40] ss:$8 sps:$4 sm:$0xff]   ;;  %v1186_v33 = vld [vmem:[#allocation5 + $0x54] ss:$8 sps:$4 sm:$0xff]   ;;  %v1172_v35 = vld [vmem:[#allocation5 + $0x104] ss:$8 sps:$4 sm:$0xff]   ;;  %p1347_p13 = por %p1346_p12, %p1345_p11 }
  0x41   :  { %v100_v12 = vcombine.high %v92_v9, %v92_v9  ;;  %v108_v13 = vsel %vm106_vm0, %v92_v9, 0  ;;  %v101_v16 = vcombine.high %v99_v11, %v99_v11  ;;  %v114_v20 = vsel %vm106_vm0, %v99_v11, 0  ;;  %750 = vmatprep.subr.bf16.mxu1 %v1168_v22  ;;  %v1191_v37 = vld [vmem:[#allocation5 + $0x50] ss:$8 sps:$4 sm:$0xff]   ;;  %v1192_v38 = vld [vmem:[#allocation5 + $0x64] ss:$8 sps:$4 sm:$0xff]  }
  0x42   :  { %v229_v36 = vsel %vm221_vm2, %v1161_v31, 0  ;;  %v1197_v39 = vld [vmem:[#allocation5 + $0x60] ss:$8 sps:$4 sm:$0xff]   ;;  %v1198_v40 = vld [vmem:[#allocation5 + $0x74] ss:$8 sps:$4 sm:$0xff]   ;;  %p1348_p0 = pnand %p1347_p13, %p1341_p10 }
  0x43   :  { %1024 = vmatprep.subr.msk.bf16.mxu0 %vm106_vm0, %v100_v12  ;;  %v1170_v41 = vld [vmem:[#allocation5 + $0x100] ss:$8 sps:$4 sm:$0xff]   ;;  %v1178_v42 = vld [vmem:[#allocation5 + $0x114] ss:$8 sps:$4 sm:$0xff]   ;;  %v1203_v43 = vld [vmem:[#allocation5 + $0x70] ss:$8 sps:$4 sm:$0xff]  }
  0x44   :  { %120 = vmatpush1.bf16.msra.mxu0 %v108_v13  ;;  %751 = vmatpush1.bf16.msra.mxu1 %v1173_v24  ;;  %v1204_v44 = vld [vmem:[#allocation5 + $0x84] ss:$8 sps:$4 sm:$0xff]   ;;  %v1176_v45 = vld [vmem:[#allocation5 + $0x110] ss:$8 sps:$4 sm:$0xff]   ;;  %v1209_v47 = vld [vmem:[#allocation5 + $0x80] ss:$8 sps:$4 sm:$0xff]  }
  0x45   :  { %1026 = vmatprep.subr.msk.bf16.mxu0 %vm106_vm0, %v101_v16  ;;  %752 = vmatprep.subr.bf16.mxu1 %v1174_v25  ;;  %v1184_v46 = vld [vmem:[#allocation5 + $0x124] ss:$8 sps:$4 sm:$0xff]   ;;  %v1210_v48 = vld [vmem:[#allocation5 + $0x94] ss:$8 sps:$4 sm:$0xff]   ;;  %v1182_v49 = vld [vmem:[#allocation5 + $0x120] ss:$8 sps:$4 sm:$0xff]  }
  0x46   :  { %v1190_v50 = vld [vmem:[#allocation5 + $0x134] ss:$8 sps:$4 sm:$0xff]   ;;  %v1188_v51 = vld [vmem:[#allocation5 + $0x130] ss:$8 sps:$4 sm:$0xff]   ;;  %v1196_v52 = vld [vmem:[#allocation5 + $0x144] ss:$8 sps:$4 sm:$0xff]  }
  0x47   :  { %1025 = vmatmul.mubr.msk.bf16.vlgmr.msra.gmra.mrb[0].mxu0 %vm102_vm1, %v78_v15  ;;  %v1194_v53 = vld [vmem:[#allocation5 + $0x140] ss:$8 sps:$4 sm:$0xff]   ;;  %v1202_v54 = vld [vmem:[#allocation5 + $0x154] ss:$8 sps:$4 sm:$0xff]   ;;  %v1200_v55 = vld [vmem:[#allocation5 + $0x150] ss:$8 sps:$4 sm:$0xff]  }
  0x48   :  { %161 = vmatpush1.bf16.msra.mxu0 %v114_v20  ;;  %192 = vmatprep.mubr.bf16.mxu0 %v1378_v3  ;;  %v1208_v56 = vld [vmem:[#allocation5 + $0x164] ss:$8 sps:$4 sm:$0xff]   ;;  %v1206_v57 = vld [vmem:[#allocation5 + $0x160] ss:$8 sps:$4 sm:$0xff]   ;;  %v1214_v58 = vld [vmem:[#allocation5 + $0x174] ss:$8 sps:$4 sm:$0xff]  }
  0x49   :  { %1032 = vmatprep.subr.msk.bf16.mxu0 %vm221_vm2, %v1156_v18  ;;  %753 = vmatpush1.bf16.msra.mxu1 %v1179_v28  ;;  %v1212_v59 = vld [vmem:[#allocation5 + $0x170] ss:$8 sps:$4 sm:$0xff]   ;;  %v1216_v61 = vld [vmem:[#allocation5 + $0xa4] ss:$8 sps:$4 sm:$0xff]   ;;  %v1218_v63 = vld [vmem:[#allocation5 + $0x180] ss:$8 sps:$4 sm:$0xff]  }
  0x4a   :  { %754 = vmatprep.subr.bf16.mxu1 %v1180_v29  ;;  %v1215_v60 = vld [vmem:[#allocation5 + $0x90] ss:$8 sps:$4 sm:$0xff]   ;;  %v1220_v62 = vld [vmem:[#allocation5 + $0x184] ss:$8 sps:$4 sm:$0xff]   ;;  %v1221_v0 = vld [vmem:[#allocation5 + $0xa0] ss:$8 sps:$4 sm:$0xff]  }
  0x4b   :  { %v1222_v1 = vld [vmem:[#allocation5 + $0xb4] ss:$8 sps:$4 sm:$0xff]   ;;  %v1227_v5 = vld [vmem:[#allocation5 + $0xb0] ss:$8 sps:$4 sm:$0xff]   ;;  %v1228_v6 = vld [vmem:[#allocation5 + $0xc4] ss:$8 sps:$4 sm:$0xff]  }
  0x4c   :  { %v1226_v2 = vld [vmem:[#allocation5 + $0x194] ss:$8 sps:$4 sm:$0xff]   ;;  %v1232_v7 = vld [vmem:[#allocation5 + $0x1a4] ss:$8 sps:$4 sm:$0xff]   ;;  %v1230_v8 = vld [vmem:[#allocation5 + $0x1a0] ss:$8 sps:$4 sm:$0xff]  }
  0x4d   :  { %755 = vmatpush1.bf16.msra.mxu1 %v1185_v32  ;;  %v1233_v9 = vld [vmem:[#allocation5 + $0xc0] ss:$8 sps:$4 sm:$0xff]   ;;  %v1234_v10 = vld [vmem:[#allocation5 + $0xd4] ss:$8 sps:$4 sm:$0xff]   ;;  %v1236_v12 = vld [vmem:[#allocation5 + $0x1b0] ss:$8 sps:$4 sm:$0xff]  }
  0x4e   :  { %756 = vmatprep.subr.bf16.mxu1 %v1186_v33  ;;  %v1238_v11 = vld [vmem:[#allocation5 + $0x1b4] ss:$8 sps:$4 sm:$0xff]   ;;  %v1239_v13 = vld [vmem:[#allocation5 + $0xd0] ss:$8 sps:$4 sm:$0xff]   ;;  %v1240_v14 = vld [vmem:[#allocation5 + $0xe4] ss:$8 sps:$4 sm:$0xff]  }
  0x4f   :  { %1027 = vmatmul.mubr.msk.bf16.vlgmr.msra.gmra.mrb[4].mxu0 %vm102_vm1, %v78_v15  ;;  %v1244_v15 = vld [vmem:[#allocation5 + $0x1c4] ss:$8 sps:$4 sm:$0xff]   ;;  %v1242_v16 = vld [vmem:[#allocation5 + $0x1c0] ss:$8 sps:$4 sm:$0xff]   ;;  %v1246_v18 = vld [vmem:[#allocation5 + $0xf4] ss:$8 sps:$4 sm:$0xff]  }
  0x50   :  { %235 = vmatpush1.bf16.msra.mxu0 %v223_v27  ;;  %266 = vmatprep.mubr.bf16.mxu0 %v1378_v3  ;;  %v1245_v17 = vld [vmem:[#allocation5 + $0xe0] ss:$8 sps:$4 sm:$0xff]   ;;  %v1250_v19 = vld [vmem:[#allocation5 + $0x1d4] ss:$8 sps:$4 sm:$0xff]   ;;  %v1248_v20 = vld [vmem:[#allocation5 + $0x1d0] ss:$8 sps:$4 sm:$0xff]  }
  0x51   :  { %1034 = vmatprep.subr.msk.bf16.mxu0 %vm221_vm2, %v1159_v26  ;;  %757 = vmatpush1.bf16.msra.mxu1 %v1191_v37  ;;  %v1251_v21 = vld [vmem:[#allocation5 + $0xf0] ss:$8 sps:$4 sm:$0xff]   ;;  %v1254_v22 = vld [vmem:[#allocation5 + $0x1e4] ss:$8 sps:$4 sm:$0xff]   ;;  %v1252_v23 = vld [vmem:[#allocation5 + $0x1e0] ss:$8 sps:$4 sm:$0xff]  }
  0x52   :  { %758 = vmatprep.subr.bf16.mxu1 %v1192_v38  ;;  %v1257_v24 = vld [vmem:[#allocation5 + $0x1f4] ss:$8 sps:$4 sm:$0xff]   ;;  %v1255_v25 = vld [vmem:[#allocation5 + $0x1f0] ss:$8 sps:$4 sm:$0xff]   ;;  %v1258_v26 = vld [vmem:[#allocation7 + $0x40] sm:$0xff]   ;;  %v324_v37 = vsub.s32 1, %v1467_v4 }
  0x55   :  { %759 = vmatpush1.bf16.msra.mxu1 %v1197_v39 }
  0x56   :  { %760 = vmatprep.subr.bf16.mxu1 %v1198_v40 }
  0x57   :  { %1033 = vmatmul.mubr.msk.bf16.vlgmr.msra.gmra.mrb[8].mxu0 %vm217_vm3, %v76_v34 }
  0x58   :  { %276 = vmatpush1.bf16.msra.mxu0 %v229_v36  ;;  %307 = vmatprep.mubr.bf16.mxu0 %v1378_v3  ;;  %v1224_v3 = vld [vmem:[#allocation5 + $0x190] ss:$8 sps:$4 sm:$0xff]   ;;  %v316_v36 = vld [vmem:[%s1531_s4] sm:$0xf] }
  0x59   :  { %787 = vmatprep.subr.bf16.mxu0 %v1172_v35  ;;  %761 = vmatpush1.bf16.msra.mxu1 %v1203_v43  ;;  %v320_v35 = vsub.s32 0, %v1467_v4  ;;  %v325_v40 = vrot.slane %v316_v36, %v324_v37 }
  0x5a   :  { %762 = vmatprep.subr.bf16.mxu1 %v1204_v44 }
  0x5b   :  { %v321_v38 = vrot.slane %v316_v36, %v320_v35 }
  0x5d   :  { %763 = vmatpush1.bf16.msra.mxu1 %v1209_v47  ;;  %v328_v47 = vsub.s32 2, %v1467_v4 }
  0x5e   :  { %764 = vmatprep.subr.bf16.mxu1 %v1210_v48  ;;  %v332_v48 = vsub.s32 3, %v1467_v4 }
  0x5f   :  { %1035 = vmatmul.mubr.msk.bf16.vlgmr.msra.gmra.mrb[12].mxu0 %vm217_vm3, %v76_v34 }
  0x60   :  { %788 = vmatpush1.bf16.msra.mxu0 %v1170_v41 }
  0x61   :  { %789 = vmatprep.subr.bf16.mxu0 %v1178_v42  ;;  %765 = vmatpush1.bf16.msra.mxu1 %v1215_v60  ;;  %v1260_v60 = vld [vmem:[#allocation7 + $0x48] sm:$0xff]  }
  0x62   :  { %766 = vmatprep.subr.bf16.mxu1 %v1216_v61 }
  0x64   :  { %790 = vmatpush1.bf16.msra.mxu0 %v1176_v45 }
  0x65   :  { %791 = vmatprep.subr.bf16.mxu0 %v1184_v46  ;;  %767 = vmatpush1.bf16.msra.mxu1 %v1221_v0 }
  0x66   :  { %768 = vmatprep.subr.bf16.mxu1 %v1222_v1 }
  0x68   :  { %792 = vmatpush1.bf16.msra.mxu0 %v1182_v49 }
  0x69   :  { %793 = vmatprep.subr.bf16.mxu0 %v1190_v50  ;;  %769 = vmatpush1.bf16.msra.mxu1 %v1227_v5  ;;  %v1262_v5 = vld [vmem:[#allocation7 + $0x50] sm:$0xff]  }
  0x6a   :  { %770 = vmatprep.subr.bf16.mxu1 %v1228_v6 }
  0x6c   :  { %794 = vmatpush1.bf16.msra.mxu0 %v1188_v51 }
  0x6d   :  { %795 = vmatprep.subr.bf16.mxu0 %v1196_v52  ;;  %771 = vmatpush1.bf16.msra.mxu1 %v1233_v9  ;;  %v329_v52 = vrot.slane %v316_v36, %v328_v47 }
  0x6e   :  { %772 = vmatprep.subr.bf16.mxu1 %v1234_v10  ;;  %v1264_v10 = vld [vmem:[#allocation7 + $0x58] sm:$0xff]  }
  0x70   :  { %796 = vmatpush1.bf16.msra.mxu0 %v1194_v53 }
  0x71   :  { %797 = vmatprep.subr.bf16.mxu0 %v1202_v54  ;;  %773 = vmatpush1.bf16.msra.mxu1 %v1239_v13  ;;  %v333_v54 = vrot.slane %v316_v36, %v332_v48  ;;  %v1267_v13 = vld [vmem:[#allocation7 + $0x20] sm:$0xff]  }
  0x72   :  { %774 = vmatprep.subr.bf16.mxu1 %v1240_v14  ;;  %v1268_v14 = vld [vmem:[#allocation7 + $0x68] sm:$0xff]  }
  0x74   :  { %798 = vmatpush1.bf16.msra.mxu0 %v1200_v55 }
  0x75   :  { %799 = vmatprep.subr.bf16.mxu0 %v1208_v56  ;;  %775 = vmatpush1.bf16.msra.mxu1 %v1245_v17  ;;  %v1259_v56 = vld [vmem:[#allocation7] sm:$0xff]   ;;  %v1271_v17 = vld [vmem:[#allocation7 + $0x30] sm:$0xff]  }
  0x76   :  { %776 = vmatprep.subr.bf16.mxu1 %v1246_v18  ;;  %v1272_v18 = vld [vmem:[#allocation7 + $0x78] sm:$0xff]  }
  0x78   :  { %800 = vmatpush1.bf16.msra.mxu0 %v1206_v57 }
  0x79   :  { %801 = vmatprep.subr.bf16.mxu0 %v1214_v58  ;;  %777 = vmatpush1.bf16.msra.mxu1 %v1251_v21 }
  0x7a   :  { %1117 = vmatprep.subr.bf16.mxu1 %v1258_v26 }
  0x7c   :  { %802 = vmatpush1.bf16.msra.mxu0 %v1212_v59 }
  0x7d   :  { %803 = vmatprep.subr.bf16.mxu0 %v1220_v62 }
  0x80   :  { %804 = vmatpush1.bf16.msra.mxu0 %v1218_v63 }
  0x81   :  { %805 = vmatprep.subr.bf16.mxu0 %v1226_v2  ;;  %v1261_v2 = vld [vmem:[#allocation7 + $0x8] sm:$0xff]  }
  0x84   :  { %806 = vmatpush1.bf16.msra.mxu0 %v1224_v3 }
  0x85   :  { %807 = vmatprep.subr.bf16.mxu0 %v1232_v7 }
  0x88   :  { %808 = vmatpush1.bf16.msra.mxu0 %v1230_v8  ;;  %v1263_v8 = vld [vmem:[#allocation7 + $0x10] sm:$0xff]  }
  0x89   :  { %809 = vmatprep.subr.bf16.mxu0 %v1238_v11  ;;  %v1265_v11 = vld [vmem:[#allocation7 + $0x18] sm:$0xff]  }
  0x8c   :  { %810 = vmatpush1.bf16.msra.mxu0 %v1236_v12  ;;  %v1266_v12 = vld [vmem:[#allocation7 + $0x60] sm:$0xff]  }
  0x8d   :  { %811 = vmatprep.subr.bf16.mxu0 %v1244_v15  ;;  %v1269_v15 = vld [vmem:[#allocation7 + $0x28] sm:$0xff]  }
  0x90   :  { %812 = vmatpush1.bf16.msra.mxu0 %v1242_v16  ;;  %v1270_v16 = vld [vmem:[#allocation7 + $0x70] sm:$0xff]  }
  0x91   :  { %813 = vmatprep.subr.bf16.mxu0 %v1250_v19  ;;  %v1273_v19 = vld [vmem:[#allocation7 + $0x38] sm:$0xff]  }
  0x94   :  { %814 = vmatpush1.bf16.msra.mxu0 %v1248_v20  ;;  %v414_v20 = vld [vmem:[%s1533_s6] sm:$0x3] }
  0x95   :  { %815 = vmatprep.subr.bf16.mxu0 %v1254_v22  ;;  %v419_v21 = vrot.slane %v414_v20, %v320_v35 }
  0x98   :  { %816 = vmatpush1.bf16.msra.mxu0 %v1252_v23 }
  0x99   :  { %817 = vmatprep.subr.bf16.mxu0 %v1257_v24 }
  0x9c   :  { %818 = vmatpush1.bf16.msra.mxu0 %v1255_v25 }
 0x11a   :  { %v153_v27 = vpop.f32.mrb[0].mxu0 }
 0x11b   :  { %v155_v28 = vpop.f32.mrb[1].mxu0 }
 0x11c   :  { %v157_v29 = vpop.f32.mrb[2].mxu0 }
 0x11d   :  { %v158_v30 = vpop.f32.mrb[3].mxu0 }
 0x122   :  { %v194_v31 = vpop.f32.mrb[4].mxu0 }
 0x123   :  { %v196_v32 = vpop.f32.mrb[5].mxu0 }
 0x124   :  { %v198_v33 = vpop.f32.mrb[6].mxu0 }
 0x125   :  { %v199_v34 = vpop.f32.mrb[7].mxu0 }
 0x12a   :  { %v268_v39 = vpop.f32.mrb[8].mxu0 }
 0x12b   :  { %v269_v41 = vadd.f32 %v268_v39, %v153_v27  ;;  %v270_v42 = vpop.f32.mrb[9].mxu0  ;;  %v423_v27 = vrot.slane %v414_v20, %v324_v37 }
 0x12c   :  { %v271_v43 = vadd.f32 %v270_v42, %v155_v28  ;;  %v272_v44 = vpop.f32.mrb[10].mxu0 }
 0x12d   :  { %v338_v45 = vadd.f32 %v321_v38, %v269_v41  ;;  %v273_v46 = vpop.f32.mrb[11].mxu0  ;;  %v1100_v41 = vld [vmem:[%s1535_s8] ss:$0 sm:$0xff] }
 0x12e   :  { %v339_v49 = vadd.f32 %v325_v40, %v271_v43 }
 0x12f   :  { %v342_v50 = vmax.f32 %v338_v45, 0.0 }
 0x130   :  { %v343_v51 = vmax.f32 %v339_v49, 0.0 }
 0x131   :  { %v346_v57 = vpack.c.bf16 %v342_v50, %v342_v50 }
 0x132   :  { %v309_v53 = vpop.f32.mrb[12].mxu0  ;;  %v347_v55 = vpack.c.bf16 %v343_v51, %v343_v51 }
 0x133   :  { %v310_v58 = vadd.f32 %v309_v53, %v194_v31  ;;  %v311_v59 = vpop.f32.mrb[13].mxu0 }
 0x134   :  { %v312_v61 = vadd.f32 %v311_v59, %v196_v32  ;;  %v313_v62 = vpop.f32.mrb[14].mxu0  ;;  %778 = vmatprep.mubr.bf16.mxu1 %v347_v55 }
 0x135   :  { %v340_v63 = vadd.f32 %v329_v52, %v310_v58  ;;  %v314_v0 = vpop.f32.mrb[15].mxu0  ;;  %779 = vmatmul.mubr.bf16.vlgmr.msra.gmra.mrb[0].mxu1 %v346_v57 }
 0x136   :  { %v341_v1 = vadd.f32 %v333_v54, %v312_v61  ;;  %1118 = vmatpush3.bf16.msra.mxu1 %v1259_v56 }
 0x137   :  { %v344_v3 = vmax.f32 %v340_v63, 0.0  ;;  %1119 = vmatprep.subr.bf16.mxu1 %v1260_v60 }
 0x138   :  { %v345_v6 = vmax.f32 %v341_v1, 0.0 }
 0x139   :  { %v348_v9 = vpack.c.bf16 %v344_v3, %v344_v3 }
 0x13a   :  { %v349_v7 = vpack.c.bf16 %v345_v6, %v345_v6  ;;  %1120 = vmatpush3.bf16.msra.mxu1 %v1261_v2 }
 0x13b   :  { %1121 = vmatprep.subr.bf16.mxu1 %v1262_v5 }
 0x13c   :  { %819 = vmatprep.mubr.bf16.mxu0 %v349_v7 }
 0x13d   :  { %820 = vmatmul.mubr.bf16.vlgmr.msra.gmra.mrb[16].mxu0 %v348_v9 }
 0x13e   :  { %1122 = vmatpush3.bf16.msra.mxu1 %v1263_v8 }
 0x13f   :  { %1123 = vmatprep.subr.bf16.mxu1 %v1264_v10 }
 0x142   :  { %1124 = vmatpush3.bf16.msra.mxu1 %v1265_v11 }
 0x143   :  { %1125 = vmatprep.subr.bf16.mxu1 %v1266_v12 }
 0x146   :  { %1126 = vmatpush3.bf16.msra.mxu1 %v1267_v13 }
 0x147   :  { %1127 = vmatprep.subr.bf16.mxu1 %v1268_v14 }
 0x14a   :  { %1128 = vmatpush3.bf16.msra.mxu1 %v1269_v15 }
 0x14b   :  { %1129 = vmatprep.subr.bf16.mxu1 %v1270_v16 }
 0x14e   :  { %1130 = vmatpush3.bf16.msra.mxu1 %v1271_v17 }
 0x14f   :  { %1131 = vmatprep.subr.bf16.mxu1 %v1272_v18 }
 0x152   :  { %1132 = vmatpush3.bf16.msra.mxu1 %v1273_v19 }
 0x208   :  { %v780_v22 = vpop.f32.mrb[0].mxu1 }
 0x209   :  { %v781_v23 = vadd.f32 %v780_v22, %v419_v21  ;;  %v782_v24 = vpop.f32.mrb[1].mxu1 }
 0x20a   :  { %v784_v25 = vpop.f32.mrb[2].mxu1  ;;  %v783_v28 = vadd.f32 %v782_v24, %v423_v27 }
 0x20b   :  { %v785_v26 = vpop.f32.mrb[3].mxu1 }
 0x210   :  { %v821_v29 = vpop.f32.mrb[16].mxu0 }
 0x211   :  { %v822_v30 = vadd.f32 %v821_v29, %v781_v23  ;;  %v823_v31 = vpop.f32.mrb[17].mxu0 }
 0x212   :  { %v824_v32 = vadd.f32 %v823_v31, %v783_v28  ;;  %v825_v33 = vpop.f32.mrb[18].mxu0 }
 0x213   :  { %v828_v34 = vmax.f32 %v822_v30, 0.0  ;;  %v826_v36 = vpop.f32.mrb[19].mxu0 }
 0x214   :  { %v829_v38 = vmax.f32 %v824_v32, 0.0 }
 0x215   :  { %v830_v40 = vpack.c.bf16 %v828_v34, %v828_v34 }
 0x216   :  { %v831_v39 = vpack.c.bf16 %v829_v38, %v829_v38 }
 0x218   :  { %999 = vmatprep.mubr.bf16.mxu1 %v831_v39 }
 0x219   :  { %1000 = vmatmul.mubr.bf16.vlgmr.msra.gmra.mrb[4].mxu1 %v830_v40 }
 0x2ec   :  { %v1133_v35 = vpop.f32.mrb[4].mxu1 }
 0x2ed   :  { %v1134_v4 = vpop.f32.mrb[5].mxu1 }
 0x2ee   :  { %v1135_v37 = vadd.f32 %v1134_v4, %v1133_v35  ;;  %v1136_v42 = vpop.f32.mrb[6].mxu1 }
 0x2ef   :  { %v1137_v43 = vpop.f32.mrb[7].mxu1 }
 0x2f0   :  { %v1002_v44 = vadd.f32 %v1135_v37, %v1100_v41 }
 0x2f2   :  { %1007 = vst [vmem:[#allocation8] sm:$0xff] %v1002_v44 }
 0x2f3   :  { %1351 = shalt.err (!%p1348_p0)
}
 0x2f4   :  { %s1352_s8 = scalar_lea.hbm %s1536_s9, 128 }
 0x2f5   :  { %p1353_p1 = scmp.ne.s32.totalorder %s1536_s9, %s1352_s8  ;;  %p1356_p2 = scmp.lt.u32.totalorder %s1352_s8, %s1536_s9 }
 0x2f7   :  { %p1358_p3 = pnand %p1356_p2, %p1353_p1 }
 0x2f9   :  { %1361 = shalt.err (!%p1358_p3)
}
 0x2fa   :  { %1017 = dma.vmem_to_hbm [thread:$0]  %s1015_s13, 128, %s1536_s9, [#allocation4]  }
 0x2fb   :  { %1366 = dma.done.wait [#allocation4], 128  }
 0x2fc   :  { %1367 = vsyncadd [#allocation4], 4294967168 }
 0x2fd   :  { %1021 = vsyncpa [#allocation3], 1 }
 0x2fe   :  { %1022 = vsyncpa [#allocation6], 1 }
 0x2ff   :  { %1023 = vsyncpa [#allocation4], 1 }

</bundles_post_ra>
